<compile_context>
chip_gen: v7x
topology: tpu7x:2x2x1
jax: 0.10.0
libtpu: 0.0.40
codegen_flags: <defaults>
</compile_context>

<pallas_src>
import functools
import math

import numpy as np
import jax
import jax.numpy as jnp
from jax.experimental import pallas as pl
from jax.experimental.pallas import tpu as pltpu


def _dct_matrix_np(n: int) -> np.ndarray:
    """Orthonormal DCT-II matrix D so dct(x, norm='ortho') = D @ x (host constant)."""
    k = np.arange(n, dtype=np.float32)[:, None]
    m = np.arange(n, dtype=np.float32)[None, :]
    cosines = np.cos(np.pi * k * (2.0 * m + 1.0) / (2.0 * n))
    scale = np.where(k == 0, 1.0 / np.sqrt(np.float32(n)), np.sqrt(2.0 / np.float32(n)))
    return (cosines * scale).astype(np.float32)


def _round_up(x: int, m: int) -> int:
    return -(-x // m) * m


def _pick_tile_t(t: int) -> int:
    """Lane tile over the time axis: multiple of 128 when possible, bounded <=512."""
    if t < 128:
        return _round_up(t, 8)          # single tile, last dim == full (padded) dim
    return 128 * min(4, -(-t // 128))


def _pick_batch_per_block(b: int, cw: int, target_rows: int = 128,
                          row_cap: int = 1024) -> int:
    """Smallest nb dividing b with nb*cw a multiple of 8 (sublane constraint) and
    >= target_rows (fills the MXU M dim); bounded by row_cap so the resident x
    block stays small on VMEM-constrained chips (v7x)."""
    chosen = None
    for nb in range(1, b + 1):
        if b % nb:
            continue
        rows = nb * cw
        if rows % 8 != 0 and nb != b:
            continue
        if chosen is not None and rows > row_cap:
            break
        chosen = nb
        if rows >= target_rows:
            break
    return chosen if chosen is not None else b


def _fused_dct_attn_kernel(x_ref, pT_ref, o_ref, *, nb, C, W, scale):
    # x_ref : (nb*C*W, T)       bf16, t-last layout; block index constant along the
    #                           inner t grid axis -> stays resident, no re-DMA.
    # pT_ref: (T, tile_t)       bf16 column slab of Pᵀ (P = DᵀD, fused dct∘idct).
    # o_ref : (nb*C*W, tile_t)  f32, lane-dense output slab (time on lanes).
    y = jnp.dot(x_ref[...], pT_ref[...],
                preferred_element_type=jnp.float32)            # MXU bf16 -> f32 acc
    tile_t = y.shape[-1]

    # Split leading (sublane-side) dims only; W is a multiple of 8 for the target
    # shapes, so this is a view, not a VMEM relayout.
    q = y.reshape(nb, C, W, tile_t)                            # Q = K = V

    # dot[b,c,k,t] = sum_w q[b,c,w,t] * q[b,k,w,t] / sqrt(32)   (reference scale)
    # Tiny C/W contraction: VPU multiplies + sublane reduce, t fills the lanes.
    s = jnp.sum(q[:, :, None, :, :] * q[:, None, :, :, :], axis=3) * scale  # (nb,C,C,t)

    # Softmax over k (axis=2); divide replaced by EUP approx reciprocal.
    m = jnp.max(s, axis=2, keepdims=True)
    e = jnp.exp(s - m)
    denom = jnp.sum(e, axis=2, keepdims=True)
    attn = e * pl.reciprocal(denom, approx=True)

    # TODO(synk): Dropout(p=0.1) on attn is identity in eval mode; PyTorch
    # training-mode RNG cannot be reproduced, so it is omitted (eval-only kernel).

    # out[b,c,w,t] = sum_k attn[b,c,k,t] * q[b,k,w,t]   (pure VPU adds over k=C)
    out = jnp.sum(attn[:, :, :, None, :] * q[:, None, :, :, :], axis=2)     # (nb,C,W,t)
    o_ref[...] = out.reshape(nb * C * W, tile_t).astype(o_ref.dtype)


def dct_attention(x: jnp.ndarray) -> jnp.ndarray:
    """Forward pass of DCTAttention (eval mode). x: (B, T, C, W) float32."""
    B, T, C, W = x.shape
    CW = C * W

    # t-last layout: rows = (b, c, w), lanes = t.  One XLA transpose of plumbing,
    # then cast to bf16 for the MXU.
    x_t = x.transpose(0, 2, 3, 1).reshape(B * CW, T).astype(jnp.bfloat16)

    # Host-constant fused DCT∘IDCT operator over T (orthonormal round trip).
    d = _dct_matrix_np(T)
    p_T = (d.T @ d).T                                          # (T, T) f32, ≈ identity

    tile_t = _pick_tile_t(T)
    t_pad = _round_up(T, tile_t)
    p_T = np.pad(p_T, ((0, 0), (0, t_pad - T)))                # zero cols -> sliced later
    p_T = jnp.asarray(p_T, dtype=jnp.bfloat16)

    nb = _pick_batch_per_block(B, CW)
    rows = nb * CW
    n_m = B // nb
    n_t = t_pad // tile_t

    kernel = functools.partial(_fused_dct_attn_kernel, nb=nb, C=C, W=W,
                               scale=1.0 / math.sqrt(32.0))

    y_t = pl.pallas_call(
        kernel,
        out_shape=jax.ShapeDtypeStruct((B * CW, t_pad), jnp.float32),
        grid=(n_m, n_t),                                       # t is the inner axis
        in_specs=[
            pl.BlockSpec((rows, T), lambda m, t: (m, 0)),      # resident across t
            pl.BlockSpec((T, tile_t), lambda m, t: (0, t)),
        ],
        out_specs=pl.BlockSpec((rows, tile_t), lambda m, t: (m, t)),
        compiler_params=pltpu.CompilerParams(
            dimension_semantics=("parallel", "parallel"),
            vmem_limit_bytes=64 * 1024 * 1024),
    )(x_t, p_T)

    y = y_t[:, :T].reshape(B, C, W, T).transpose(0, 3, 1, 2)   # back to (B, T, C, W)
    return y.astype(x.dtype)


if __name__ == "__main__":
    key = jax.random.PRNGKey(0)
    B, T, C, W = 2, 8, 4, 16   # small shapes consistent with the (B, T, C, W) input
    x = jax.random.normal(key, (B, T, C, W), dtype=jnp.float32)

    fn = jax.jit(dct_attention)
    out = fn(x)
    jax.block_until_ready(out)

    assert out.shape == (B, T, C, W), out.shape
    assert out.dtype == jnp.float32, out.dtype

    # Pure-JAX reference: dct∘idct is an orthonormal round trip (identity), so the
    # reference output equals self-attention on (C, W) with the 1/sqrt(32) scale.
    # Compare against bf16-quantized inputs (the kernel feeds the MXU in bf16).
    xq = x.astype(jnp.bfloat16).astype(jnp.float32)
    dot = jnp.einsum("btcw,btkw->btck", xq, xq) / math.sqrt(32.0)
    attn = jax.nn.softmax(dot, axis=-1)
    ref = jnp.einsum("btck,btkw->btcw", attn, xq)
    err = float(jnp.max(jnp.abs(out - ref)))
    assert err < 5e-2, f"max abs err {err}"    # approx reciprocal + P≈I rounding

    print("KERNEL_OK")
</pallas_src>

<mosaic_0001>
module attributes {stable_mosaic.version = 11 : i64} {
  func.func @_fused_dct_attn_kernel(%arg0: i32, %arg1: i32, %arg2: memref<128x8xbf16, #tpu.memory_space<vmem>>, %arg3: memref<8x8xbf16, #tpu.memory_space<vmem>>, %arg4: memref<128x8xf32, #tpu.memory_space<vmem>>) attributes {dimension_semantics = [#tpu.dimension_semantics<parallel>, #tpu.dimension_semantics<parallel>], iteration_bounds = array<i64: 1, 1>, scalar_prefetch = 0 : i64, scratch_operands = 0 : i64, tpu.core_type = #tpu.core_type<tc>, window_params = [{transform_indices = @transform_0, window_bounds = array<i64: 128, 8>}, {transform_indices = @transform_1, window_bounds = array<i64: 8, 8>}, {transform_indices = @transform_2, window_bounds = array<i64: 128, 8>}]} {
    %c0 = arith.constant 0 : index
    %c0_0 = arith.constant 0 : index
    %0 = vector.load %arg2[%c0, %c0_0] : memref<128x8xbf16, #tpu.memory_space<vmem>>, vector<128x8xbf16>
    %c0_1 = arith.constant 0 : index
    %c0_2 = arith.constant 0 : index
    %1 = vector.load %arg3[%c0_1, %c0_2] : memref<8x8xbf16, #tpu.memory_space<vmem>>, vector<8x8xbf16>
    %cst = arith.constant dense<0.000000e+00> : vector<128x8xf32>
    %2 = tpu.matmul %0, %1, %cst {dimension_numbers = #tpu.dot_dimension_numbers<[1], [0], [0], [1], [0, 0, 1, 1], [], []>} : vector<128x8xbf16>, vector<8x8xbf16>, vector<128x8xf32> -> vector<128x8xf32>
    %3 = vector.shape_cast %2 : vector<128x8xf32> to vector<2x4x16x8xf32>
    %4 = vector.shape_cast %3 : vector<2x4x16x8xf32> to vector<2x4x1x16x8xf32>
    %5 = vector.shape_cast %3 : vector<2x4x16x8xf32> to vector<2x1x4x16x8xf32>
    %6 = vector.broadcast %4 : vector<2x4x1x16x8xf32> to vector<2x4x4x16x8xf32>
    %7 = vector.broadcast %5 : vector<2x1x4x16x8xf32> to vector<2x4x4x16x8xf32>
    %8 = arith.mulf %6, %7 : vector<2x4x4x16x8xf32>
    %cst_3 = arith.constant dense<0.000000e+00> : vector<2x4x4x8xf32>
    %9 = vector.multi_reduction <add>, %8, %cst_3 [3] : vector<2x4x4x16x8xf32> to vector<2x4x4x8xf32>
    %cst_4 = arith.constant 0.176776692 : f32
    %10 = vector.broadcast %cst_4 : f32 to vector<2x4x4x8xf32>
    %11 = arith.mulf %9, %10 : vector<2x4x4x8xf32>
    %cst_5 = arith.constant dense<0xFF800000> : vector<2x4x8xf32>
    %12 = vector.multi_reduction <maximumf>, %11, %cst_5 [2] : vector<2x4x4x8xf32> to vector<2x4x8xf32>
    %13 = vector.shape_cast %12 : vector<2x4x8xf32> to vector<2x4x1x8xf32>
    %14 = vector.broadcast %13 : vector<2x4x1x8xf32> to vector<2x4x4x8xf32>
    %15 = arith.subf %11, %14 : vector<2x4x4x8xf32>
    %16 = math.exp %15 : vector<2x4x4x8xf32>
    %cst_6 = arith.constant dense<0.000000e+00> : vector<2x4x8xf32>
    %17 = vector.multi_reduction <add>, %16, %cst_6 [2] : vector<2x4x4x8xf32> to vector<2x4x8xf32>
    %18 = vector.shape_cast %17 : vector<2x4x8xf32> to vector<2x4x1x8xf32>
    %19 = tpu.reciprocal %18 {approx = true} : vector<2x4x1x8xf32> -> vector<2x4x1x8xf32>
    %20 = vector.broadcast %19 : vector<2x4x1x8xf32> to vector<2x4x4x8xf32>
    %21 = arith.mulf %16, %20 : vector<2x4x4x8xf32>
    %22 = vector.shape_cast %21 : vector<2x4x4x8xf32> to vector<2x4x4x1x8xf32>
    %23 = vector.shape_cast %3 : vector<2x4x16x8xf32> to vector<2x1x4x16x8xf32>
    %24 = vector.broadcast %22 : vector<2x4x4x1x8xf32> to vector<2x4x4x16x8xf32>
    %25 = vector.broadcast %23 : vector<2x1x4x16x8xf32> to vector<2x4x4x16x8xf32>
    %26 = arith.mulf %24, %25 : vector<2x4x4x16x8xf32>
    %cst_7 = arith.constant dense<0.000000e+00> : vector<2x4x16x8xf32>
    %27 = vector.multi_reduction <add>, %26, %cst_7 [2] : vector<2x4x4x16x8xf32> to vector<2x4x16x8xf32>
    %28 = vector.shape_cast %27 : vector<2x4x16x8xf32> to vector<128x8xf32>
    %c0_8 = arith.constant 0 : index
    %c0_9 = arith.constant 0 : index
    %29 = vector.load %arg4[%c0_8, %c0_9] : memref<128x8xf32, #tpu.memory_space<vmem>>, vector<128x8xf32>
    tpu.vector_store %arg4[%c0_8, %c0_9], %28 {strides = array<i32>} : memref<128x8xf32, #tpu.memory_space<vmem>>, vector<128x8xf32>,
    return
  }
  func.func @transform_0(%arg0: i32, %arg1: i32) -> (i32, i32) {
    %c0_i32 = arith.constant 0 : i32
    %c0_i32_0 = arith.constant 0 : i32
    return %arg0, %c0_i32 : i32, i32
  }
  func.func @transform_1(%arg0: i32, %arg1: i32) -> (i32, i32) {
    %c0_i32 = arith.constant 0 : i32
    %c0_i32_0 = arith.constant 0 : i32
    return %c0_i32, %arg1 : i32, i32
  }
  func.func @transform_2(%arg0: i32, %arg1: i32) -> (i32, i32) {
    %c0_i32 = arith.constant 0 : i32
    return %arg0, %arg1 : i32, i32
  }
}

</mosaic_0001>

<bundles_post_ra>
// kernel: dct_attention.1
= control target key start
LH: loop header
LB: loop body
LE: loop exit
PB: predicated region body
PF: predicated region fallthrough
CT: control target
= control target key end

     0   :  { %7 = vsyncpa [#allocation3], 0  ;;  %s2171_s0 = inlined_call_operand.hbm [shape: bf16[128,8], index: 0, kind: input, shape index: {}]   ;;  %s2172_s1 = inlined_call_operand.hbm [shape: bf16[8,8], index: 1, kind: input, shape index: {}]   ;;  %s2173_s2 = inlined_call_operand.hbm [shape: f32[128,8], index: 2, kind: output, shape index: {}]  }
   0x1   :  { %8 = vsyncpa [#allocation6], 0 }
   0x2   :  { %9 = vsyncpa [#allocation4], 0  ;;  %s1374_s9 = smov [#allocation2]   ;;  %s1302_s13 = scalar_lea.hbm %s2171_s0, 1024 }
   0x3   :  { %s15_s10 = sshll.u32 %s1374_s9, 4  ;;  %p1303_p0 = scmp.ne.s32.totalorder %s2171_s0, %s1302_s13  ;;  %s16_s10 = int_to_ptr.vmem [resolvable:$true] %s15_s10 }
   0x4   :  { %p1306_p1 = scmp.lt.u32.totalorder %s1302_s13, %s2171_s0 }
   0x6   :  { %p1308_p2 = pnand %p1306_p1, %p1303_p0 }
   0x8   :  { %1311 = shalt.err (!%p1308_p2)
}
   0x9   :  { %s1312_s18 = scalar_lea.vmem %s16_s10, 1024  ;;  %p1317_p4 = scmp.lt.s32.totalorder %s16_s10, %s16_s10 }
   0xa   :  { %p1313_p3 = scmp.ne.s32.totalorder %s16_s10, %s1312_s18  ;;  %p1318_p5 = scmp.lt.s32.totalorder %s1312_s18, %s1312_s18 }
   0xc   :  { %p1319_p6 = por %p1318_p5, %p1317_p4 }
   0xe   :  { %p1320_p7 = pnand %p1319_p6, %p1313_p3 }
  0x10   :  { %1323 = shalt.err (!%p1320_p7)
}
  0x11   :  { %s1375_s19 = smov 64   ;;  %s1376_s20 = smov 4  }
  0x12   :  { %21 = dma.hbm_to_vmem [thread:$0]  %s2171_s0, 1024, %s16_s10, [#allocation3], %s1375_s19, %s1375_s19, %s1376_s20  }
  0x13   :  { %s1377_s23 = smov [#allocation5]   ;;  %s1324_s27 = scalar_lea.hbm %s2172_s1, 64 }
  0x14   :  { %s28_s24 = sshll.u32 %s1377_s23, 4  ;;  %p1325_p8 = scmp.ne.s32.totalorder %s2172_s1, %s1324_s27  ;;  %s29_s24 = int_to_ptr.vmem [resolvable:$true] %s28_s24 }
  0x15   :  { %p1328_p9 = scmp.lt.u32.totalorder %s1324_s27, %s2172_s1 }
  0x17   :  { %p1330_p10 = pnand %p1328_p9, %p1325_p8 }
  0x19   :  { %1333 = shalt.err (!%p1330_p10)
}
  0x1a   :  { %s1334_s4 = scalar_lea.vmem %s29_s24, 64  ;;  %p1339_p12 = scmp.lt.s32.totalorder %s29_s24, %s29_s24 }
  0x1b   :  { %p1335_p11 = scmp.ne.s32.totalorder %s29_s24, %s1334_s4  ;;  %p1340_p13 = scmp.lt.s32.totalorder %s1334_s4, %s1334_s4 }
  0x1d   :  { %p1341_p0 = por %p1340_p13, %p1339_p12 }
  0x1f   :  { %p1342_p1 = pnand %p1341_p0, %p1335_p11 }
  0x21   :  { %1345 = shalt.err (!%p1342_p1)
}
  0x22   :  { %31 = dma.hbm_to_vmem [thread:$0]  %s2172_s1, 64, %s29_s24, [#allocation6]  }
  0x23   :  { %1368 = dma.done.wait [#allocation3], 1024  }
  0x24   :  { %1369 = vsyncadd [#allocation3], 4294966272 }
  0x25   :  { %1370 = dma.done.wait [#allocation6], 64  }
  0x26   :  { %1371 = vsyncadd [#allocation6], 4294967232  ;;  %vm121_vm0 = vcmask 1043456   ;;  %vm96_vm1 = vcmask 64512   ;;  %v55_v0 = vld [vmem:[#allocation5] sm:$0xf]  ;;  %v758_v10 = vlaneseq }
  0x27   :  { %1205 = vmatprep.subr.msk.bf16.mxu0 %vm121_vm0, %v55_v0  ;;  %1206 = vmatprep.subr.msk.bf16.mxu1 %vm121_vm0, %v55_v0  ;;  %v123_v1 = vsel %vm121_vm0, %v55_v0, 0  ;;  %v1214_v2 = vld [vmem:[#allocation2] sm:$0xff]   ;;  %v1216_v4 = vld [vmem:[#allocation2 + $0x8] sm:$0xff]   ;;  %v1218_v6 = vld [vmem:[#allocation2 + $0x10] sm:$0xff]   ;;  %vm635_vm2 = vcmask 1041409   ;;  %vm638_vm3 = vcmask 1042434  }
  0x28   :  { %1186 = vmatpush3.bf16.msra.mxu0 %v123_v1  ;;  %1204 = vmatpush3.bf16.msra.mxu1 %v123_v1  ;;  %v1215_v3 = vld [vmem:[#allocation2 + $0x20] sm:$0xff]   ;;  %v1217_v5 = vld [vmem:[#allocation2 + $0x28] sm:$0xff]   ;;  %v1219_v7 = vld [vmem:[#allocation2 + $0x30] sm:$0xff]   ;;  %v759_v11 = vshrl.u32 %v758_v10, 7  ;;  %vm641_vm4 = vcmask 1043459   ;;  %vm693_vm5 = vcmask 60416  }
  0x29   :  { %1187 = vmatprep.mubr.msk.bf16.mxu0 %vm96_vm1, %v1214_v2  ;;  %1195 = vmatprep.mubr.msk.bf16.mxu1 %vm96_vm1, %v1215_v3  ;;  %v1220_v8 = vld [vmem:[#allocation2 + $0x18] sm:$0xff]   ;;  %s1378_s1 = smov [#allocation7]  }
  0x2a   :  { %v1221_v9 = vld [vmem:[#allocation2 + $0x38] sm:$0xff]   ;;  %v1456_v26 = vsub.s32 0, %v759_v11  ;;  %s1147_s6 = sshll.u32 %s1378_s1, 4  ;;  %s1148_s6 = int_to_ptr.vmem [resolvable:$true] %s1147_s6 }
  0x2b   :  { %1188 = vmatmul.mubr.msk.bf16.vlgmr.msra.gmra.mrb[0].mxu0 %vm96_vm1, %v1216_v4  ;;  %1196 = vmatmul.mubr.msk.bf16.vlgmr.msra.gmra.mrb[0].mxu1 %vm96_vm1, %v1217_v5  ;;  %s1346_s7 = scalar_lea.vmem %s1148_s6, 2048  ;;  %p1351_p3 = scmp.lt.s32.totalorder %s1148_s6, %s1148_s6 }
  0x2c   :  { %1191 = vmatprep.mubr.msk.bf16.mxu0 %vm96_vm1, %v1218_v6  ;;  %1199 = vmatprep.mubr.msk.bf16.mxu1 %vm96_vm1, %v1219_v7  ;;  %p1347_p2 = scmp.ne.s32.totalorder %s1148_s6, %s1346_s7  ;;  %p1352_p4 = scmp.lt.s32.totalorder %s1346_s7, %s1346_s7 }
  0x2e   :  { %p1353_p5 = por %p1352_p4, %p1351_p3 }
  0x30   :  { %p1354_p6 = pnand %p1353_p5, %p1347_p2 }
  0x33   :  { %1192 = vmatmul.mubr.msk.bf16.gmra.mrb[4].mxu0 %vm96_vm1, %v1220_v8  ;;  %1200 = vmatmul.mubr.msk.bf16.gmra.mrb[4].mxu1 %vm96_vm1, %v1221_v9 }
  0xfe   :  { %v1428_v12 = vpop.f32.mrb[0].mxu0  ;;  %v1432_v14 = vpop.f32.mrb[0].mxu1 }
  0xff   :  { %v230_v13 = vmul.f32 %v1428_v12, %v1428_v12  ;;  %2194 = vst [vmem:[#allocation11_spill] sm:$0xff] %v1432_v14  ;;  %v1434_v15 = vpop.f32.mrb[1].mxu0  ;;  %v250_v16 = vmul.f32 %v1432_v14, %v1432_v14  ;;  %v1442_v19 = vpop.f32.mrb[1].mxu1 }
 0x100   :  { %v222_v17 = vmul.f32 %v1434_v15, %v1434_v15  ;;  %v224_v18 = vmul.f32 %v1428_v12, %v1434_v15  ;;  %2195 = vst [vmem:[#allocation12_spill] sm:$0xff] %v1442_v19  ;;  %v1444_v20 = vpop.f32.mrb[2].mxu0  ;;  %v242_v21 = vmul.f32 %v1442_v19, %v1442_v19  ;;  %v244_v22 = vmul.f32 %v1432_v14, %v1442_v19  ;;  %v1452_v24 = vpop.f32.mrb[2].mxu1 }
 0x101   :  { %v231_v23 = vmul.f32 %v1444_v20, %v1444_v20  ;;  %2196 = vst [vmem:[#allocation13_spill] sm:$0xff] %v1452_v24  ;;  %v1454_v25 = vpop.f32.mrb[3].mxu0  ;;  %v298_v27 = vsel %vm96_vm1, %v230_v13, 0.0  ;;  %v388_v28 = vsel %vm96_vm1, %v250_v16, 0.0  ;;  %v251_v30 = vmul.f32 %v1452_v24, %v1452_v24  ;;  %v1463_v31 = vpop.f32.mrb[3].mxu1 }
 0x102   :  { %v262_v29 = vsel %vm96_vm1, %v222_v17, 0.0  ;;  %v271_v32 = vsel %vm96_vm1, %v224_v18, 0.0  ;;  %v352_v33 = vsel %vm96_vm1, %v242_v21, 0.0  ;;  %v223_v35 = vmul.f32 %v1454_v25, %v1454_v25 }
 0x103   :  { %v299_v34 = vsel %vm96_vm1, %v231_v23, 0.0  ;;  %v389_v37 = vsel %vm96_vm1, %v251_v30, 0.0  ;;  %v225_v38 = vmul.f32 %v1444_v20, %v1454_v25  ;;  %v243_v39 = vmul.f32 %v1463_v31, %v1463_v31 }
 0x104   :  { %v300_v36 = vadd.f32 %v299_v34, %v298_v27  ;;  %v361_v40 = vsel %vm96_vm1, %v244_v22, 0.0  ;;  %v390_v41 = vadd.f32 %v389_v37, %v388_v28  ;;  %v263_v42 = vsel %vm96_vm1, %v223_v35, 0.0 }
 0x105   :  { %v245_v43 = vmul.f32 %v1452_v24, %v1463_v31  ;;  %v264_v45 = vadd.f32 %v263_v42, %v262_v29  ;;  %v272_v46 = vsel %vm96_vm1, %v225_v38, 0.0  ;;  %v353_v47 = vsel %vm96_vm1, %v243_v39, 0.0 }
 0x106   :  { %v301_v44 = vrot.slane %v300_v36, 4  ;;  %v1481_v48 = vpop.f32.mrb[4].mxu0  ;;  %v391_v49 = vrot.slane %v390_v41, 4  ;;  %v273_v50 = vadd.f32 %v272_v46, %v271_v32  ;;  %v354_v51 = vadd.f32 %v353_v47, %v352_v33  ;;  %v1484_v53 = vpop.f32.mrb[4].mxu1 }
 0x107   :  { %2197 = vst [vmem:[#allocation14_spill] sm:$0xff] %v1481_v48  ;;  %v362_v52 = vsel %vm96_vm1, %v245_v43, 0.0  ;;  %2198 = vst [vmem:[#allocation15_spill] sm:$0xff] %v1484_v53  ;;  %v1486_v54 = vpop.f32.mrb[5].mxu0  ;;  %v265_v56 = vrot.slane %v264_v45, 4  ;;  %v228_v58 = vmul.f32 %v1481_v48, %v1434_v15  ;;  %v1490_v59 = vpop.f32.mrb[5].mxu1  ;;  %v234_v0 = vmul.f32 %v1481_v48, %v1428_v12 }
 0x108   :  { %v302_v55 = vadd.f32 %v301_v44, %v300_v36  ;;  %v363_v57 = vadd.f32 %v362_v52, %v361_v40  ;;  %2199 = vst [vmem:[#allocation16_spill] sm:$0xff] %v1490_v59  ;;  %v1492_v60 = vpop.f32.mrb[6].mxu0  ;;  %v392_v61 = vadd.f32 %v391_v49, %v390_v41  ;;  %v274_v62 = vrot.slane %v273_v50, 4  ;;  %v1496_v1 = vpop.f32.mrb[6].mxu1 }
 0x109   :  { %2200 = vst [vmem:[#allocation17_spill] sm:$0xff] %v1492_v60  ;;  %v355_v63 = vrot.slane %v354_v51, 4  ;;  %2201 = vst [vmem:[#allocation18_spill] sm:$0xff] %v1496_v1  ;;  %v1498_v2 = vpop.f32.mrb[7].mxu0  ;;  %v266_v4 = vadd.f32 %v265_v56, %v264_v45  ;;  %v240_v6 = vmul.f32 %v1481_v48, %v1481_v48  ;;  %v1502_v7 = vpop.f32.mrb[7].mxu1  ;;  %v1505_v11 = vsel %vm96_vm1, %v228_v58, 0.0 }
 0x10a   :  { %2202 = vst [vmem:[#allocation19_spill] sm:$0xff] %v1498_v2  ;;  %v303_v3 = vrot.slane %v302_v55, 2  ;;  %v364_v5 = vrot.slane %v363_v57, 4  ;;  %2203 = vst [vmem:[#allocation20_spill] sm:$0xff] %v1502_v7  ;;  %v393_v8 = vrot.slane %v392_v61, 2  ;;  %v275_v9 = vadd.f32 %v274_v62, %v273_v50 }
 0x10b   :  { %v356_v10 = vadd.f32 %v355_v63, %v354_v51  ;;  %v267_v16 = vrot.slane %v266_v4, 2  ;;  %v316_v18 = vsel %vm96_vm1, %v234_v0, 0.0  ;;  %v343_v27 = vsel %vm96_vm1, %v240_v6, 0.0 }
 0x10c   :  { %v304_v13 = vadd.f32 %v303_v3, %v302_v55  ;;  %v365_v17 = vadd.f32 %v364_v5, %v363_v57  ;;  %v394_v21 = vadd.f32 %v393_v8, %v392_v61  ;;  %v276_v22 = vrot.slane %v275_v9, 2 }
 0x10d   :  { %v357_v23 = vrot.slane %v356_v10, 2  ;;  %v268_v29 = vadd.f32 %v267_v16, %v266_v4  ;;  %v248_v32 = vmul.f32 %v1484_v53, %v1442_v19  ;;  %v254_v36 = vmul.f32 %v1484_v53, %v1432_v14 }
 0x10e   :  { %v305_v28 = vrot.slane %v304_v13, 1  ;;  %v366_v30 = vrot.slane %v365_v17, 2  ;;  %v395_v33 = vrot.slane %v394_v21, 1  ;;  %v277_v34 = vadd.f32 %v276_v22, %v275_v9 }
 0x10f   :  { %v358_v35 = vadd.f32 %v357_v23, %v356_v10  ;;  %v269_v38 = vrot.slane %v268_v29, 1  ;;  %v260_v40 = vmul.f32 %v1484_v53, %v1484_v53  ;;  %v379_v44 = vsel %vm96_vm1, %v248_v32, 0.0 }
 0x110   :  { %v306_v37 = vadd.f32 %v305_v28, %v304_v13  ;;  %v367_v39 = vadd.f32 %v366_v30, %v365_v17  ;;  %v396_v41 = vadd.f32 %v395_v33, %v394_v21  ;;  %v278_v42 = vrot.slane %v277_v34, 1 }
 0x111   :  { %v359_v43 = vrot.slane %v358_v35, 1  ;;  %v270_v46 = vadd.f32 %v269_v38, %v268_v29  ;;  %v406_v49 = vsel %vm96_vm1, %v254_v36, 0.0  ;;  %v433_v55 = vsel %vm96_vm1, %v260_v40, 0.0 }
 0x112   :  { %v1516_v45 = vmul.f32 0.17677669, %v306_v37  ;;  %v368_v47 = vrot.slane %v367_v39, 1  ;;  %v1519_v50 = vmul.f32 0.17677669, %v396_v41  ;;  %v279_v51 = vadd.f32 %v278_v42, %v277_v34 }
 0x113   :  { %v360_v52 = vadd.f32 %v359_v43, %v358_v35  ;;  %v1526_v57 = vmul.f32 0.17677669, %v270_v46  ;;  %v226_v61 = vmul.f32 %v1486_v54, %v1434_v15  ;;  %v232_v3 = vmul.f32 %v1428_v12, %v1486_v54 }
 0x114   :  { %v1524_v56 = vsel %vm96_vm1, %v1516_v45, -inf  ;;  %v369_v58 = vadd.f32 %v368_v47, %v367_v39  ;;  %v1532_v62 = vsel %vm96_vm1, %v1519_v50, -inf  ;;  %v1534_v63 = vmul.f32 0.17677669, %v279_v51 }
 0x115   :  { %v1536_v0 = vmul.f32 0.17677669, %v360_v52  ;;  %v1542_v4 = vsel %vm96_vm1, %v1526_v57, -inf  ;;  %v1548_v6 = vmul.f32 %v1486_v54, %v1486_v54  ;;  %v1552_v8 = vmul.f32 %v1481_v48, %v1486_v54 }
 0x116   :  { %v1544_v5 = vmul.f32 0.17677669, %v369_v58  ;;  %v1556_v9 = vsel %vm96_vm1, %v1534_v63, -inf  ;;  %v1564_v13 = vmul.f32 %v1490_v59, %v1442_v19  ;;  %v1568_v16 = vmul.f32 %v1432_v14, %v1490_v59 }
 0x117   :  { %v1560_v10 = vsel %vm96_vm1, %v1536_v0, -inf  ;;  %v1578_v22 = vmul.f32 %v1490_v59, %v1490_v59  ;;  %v1582_v23 = vmul.f32 %v1484_v53, %v1490_v59  ;;  %v229_v29 = vmul.f32 %v1492_v60, %v1454_v25 }
 0x118   :  { %v1574_v21 = vsel %vm96_vm1, %v1544_v5, -inf  ;;  %v235_v30 = vmul.f32 %v1492_v60, %v1444_v20  ;;  %v241_v32 = vmul.f32 %v1492_v60, %v1492_v60  ;;  %v249_v33 = vmul.f32 %v1496_v1, %v1463_v31 }
 0x119   :  { %v255_v34 = vmul.f32 %v1496_v1, %v1452_v24  ;;  %v261_v35 = vmul.f32 %v1496_v1, %v1496_v1  ;;  %v227_v36 = vmul.f32 %v1498_v2, %v1454_v25  ;;  %v290_v37 = vsel %vm96_vm1, %v229_v29, 0.0 }
 0x11a   :  { %v317_v38 = vsel %vm96_vm1, %v235_v30, 0.0  ;;  %v344_v39 = vsel %vm96_vm1, %v241_v32, 0.0  ;;  %v233_v40 = vmul.f32 %v1444_v20, %v1498_v2  ;;  %v291_v41 = vadd.f32 %v290_v37, %v1505_v11 }
 0x11b   :  { %v318_v42 = vadd.f32 %v317_v38, %v316_v18  ;;  %v345_v43 = vadd.f32 %v344_v39, %v343_v27  ;;  %v380_v46 = vsel %vm96_vm1, %v249_v33, 0.0  ;;  %v407_v51 = vsel %vm96_vm1, %v255_v34, 0.0 }
 0x11c   :  { %v381_v47 = vadd.f32 %v380_v46, %v379_v44  ;;  %v434_v52 = vsel %vm96_vm1, %v261_v35, 0.0  ;;  %v237_v58 = vmul.f32 %v1498_v2, %v1498_v2  ;;  %v292_v29 = vrot.slane %v291_v41, 4 }
 0x11d   :  { %v319_v30 = vrot.slane %v318_v42, 4  ;;  %v346_v32 = vrot.slane %v345_v43, 4  ;;  %v408_v28 = vadd.f32 %v407_v51, %v406_v49  ;;  %v435_v53 = vadd.f32 %v434_v52, %v433_v55 }
 0x11e   :  { %v382_v17 = vrot.slane %v381_v47, 4  ;;  %v239_v11 = vmul.f32 %v1492_v60, %v1498_v2  ;;  %v280_v18 = vsel %vm96_vm1, %v226_v61, 0.0  ;;  %v293_v27 = vadd.f32 %v292_v29, %v291_v41 }
 0x11f   :  { %v320_v44 = vadd.f32 %v319_v30, %v318_v42  ;;  %v347_v33 = vadd.f32 %v346_v32, %v345_v43  ;;  %v409_v34 = vrot.slane %v408_v28, 4  ;;  %v436_v35 = vrot.slane %v435_v53, 4 }
 0x120   :  { %v383_v37 = vadd.f32 %v382_v17, %v381_v47  ;;  %v281_v38 = vsel %vm96_vm1, %v227_v36, 0.0  ;;  %v307_v39 = vsel %vm96_vm1, %v232_v3, 0.0  ;;  %v294_v46 = vrot.slane %v293_v27, 2 }
 0x121   :  { %v321_v59 = vrot.slane %v320_v44, 2  ;;  %v348_v49 = vrot.slane %v347_v33, 2  ;;  %v410_v51 = vadd.f32 %v409_v34, %v408_v28  ;;  %v437_v52 = vadd.f32 %v436_v35, %v435_v53 }
 0x122   :  { %v384_v55 = vrot.slane %v383_v37, 2  ;;  %v282_v14 = vadd.f32 %v281_v38, %v280_v18  ;;  %v308_v19 = vsel %vm96_vm1, %v233_v40, 0.0  ;;  %v295_v61 = vadd.f32 %v294_v46, %v293_v27 }
 0x123   :  { %v322_v41 = vadd.f32 %v321_v59, %v320_v44  ;;  %v349_v42 = vadd.f32 %v348_v49, %v347_v33  ;;  %v411_v43 = vrot.slane %v410_v51, 2  ;;  %v438_v17 = vrot.slane %v437_v52, 2 }
 0x124   :  { %v385_v29 = vadd.f32 %v384_v55, %v383_v37  ;;  %v283_v47 = vrot.slane %v282_v14, 4  ;;  %v309_v30 = vadd.f32 %v308_v19, %v307_v39  ;;  %v296_v36 = vrot.slane %v295_v61, 1 }
 0x125   :  { %v323_v32 = vrot.slane %v322_v41, 1  ;;  %v350_v3 = vrot.slane %v349_v42, 1  ;;  %v412_v60 = vadd.f32 %v411_v43, %v410_v51  ;;  %v439_v2 = vadd.f32 %v438_v17, %v437_v52 }
 0x126   :  { %v386_v48 = vrot.slane %v385_v29, 1  ;;  %v284_v28 = vadd.f32 %v283_v47, %v282_v14  ;;  %v310_v34 = vrot.slane %v309_v30, 4  ;;  %v297_v53 = vadd.f32 %v296_v36, %v295_v61 }
 0x127   :  { %v324_v18 = vadd.f32 %v323_v32, %v322_v41  ;;  %v351_v35 = vadd.f32 %v350_v3, %v349_v42  ;;  %v413_v40 = vrot.slane %v412_v60, 1  ;;  %v440_v59 = vrot.slane %v439_v2, 1 }
 0x128   :  { %v387_v27 = vadd.f32 %v386_v48, %v385_v29  ;;  %v285_v44 = vrot.slane %v284_v28, 2  ;;  %v311_v33 = vadd.f32 %v310_v34, %v309_v30  ;;  %v1617_v37 = vmul.f32 0.17677669, %v297_v53 }
 0x129   :  { %v1619_v38 = vmul.f32 0.17677669, %v324_v18  ;;  %v1621_v19 = vmul.f32 0.17677669, %v351_v35  ;;  %v414_v39 = vadd.f32 %v413_v40, %v412_v60  ;;  %v441_v46 = vadd.f32 %v440_v59, %v439_v2 }
 0x12a   :  { %v1623_v49 = vmul.f32 0.17677669, %v387_v27  ;;  %v286_v14 = vadd.f32 %v285_v44, %v284_v28  ;;  %v312_v51 = vrot.slane %v311_v33, 2  ;;  %v325_v52 = vsel %vm96_vm1, %v1548_v6, 0.0 }
 0x12b   :  { %v1627_v55 = vsel %vm96_vm1, %v1621_v19, -inf  ;;  %v1629_v48 = vmul.f32 0.17677669, %v414_v39  ;;  %v326_v61 = vsel %vm96_vm1, %v237_v58, 0.0  ;;  %v1634_v41 = vmul.f32 0.17677669, %v441_v46 }
 0x12c   :  { %v287_v42 = vrot.slane %v286_v14, 1  ;;  %v313_v60 = vadd.f32 %v312_v51, %v311_v33  ;;  %v327_v2 = vadd.f32 %v326_v61, %v325_v52  ;;  %v334_v43 = vsel %vm96_vm1, %v1552_v8, 0.0 }
 0x12d   :  { %v335_v29 = vsel %vm96_vm1, %v239_v11, 0.0  ;;  %v1641_v17 = vsel %vm96_vm1, %v1617_v37, -inf  ;;  %v470_v47 = vmax.f32 %v1556_v9, %v1524_v56  ;;  %v1647_v6 = vsel %vm96_vm1, %v1634_v41, -inf }
 0x12e   :  { %v288_v58 = vadd.f32 %v287_v42, %v286_v14  ;;  %v314_v30 = vrot.slane %v313_v60, 1  ;;  %v328_v36 = vrot.slane %v327_v2, 4  ;;  %v336_v32 = vadd.f32 %v335_v29, %v334_v43 }
 0x12f   :  { %v1651_v8 = vsel %vm96_vm1, %v1619_v38, -inf  ;;  %v247_v11 = vmul.f32 %v1502_v7, %v1463_v31  ;;  %v253_v3 = vmul.f32 %v1452_v24, %v1502_v7  ;;  %v257_v35 = vmul.f32 %v1502_v7, %v1502_v7 }
 0x130   :  { %v315_v28 = vadd.f32 %v314_v30, %v313_v60  ;;  %v329_v56 = vadd.f32 %v328_v36, %v327_v2  ;;  %v1657_v34 = vmul.f32 0.17677669, %v288_v58  ;;  %v480_v53 = vmax.f32 %v1641_v17, %v1651_v8 }
 0x131   :  { %v337_v18 = vrot.slane %v336_v32, 4  ;;  %v259_v40 = vmul.f32 %v1496_v1, %v1502_v7  ;;  %v370_v27 = vsel %vm96_vm1, %v1564_v13, 0.0  ;;  %v371_v39 = vsel %vm96_vm1, %v247_v11, 0.0 }
 0x132   :  { %v330_v59 = vrot.slane %v329_v56, 2  ;;  %v1667_v44 = vmul.f32 0.17677669, %v315_v28  ;;  %v465_v33 = vsel %vm96_vm1, %v1657_v34, -inf  ;;  %v2204_v14 = vmax.f32 %v1542_v4, %v1556_v9 }
 0x133   :  { %v338_v46 = vadd.f32 %v337_v18, %v336_v32  ;;  %v372_v52 = vadd.f32 %v371_v39, %v370_v27  ;;  %v397_v61 = vsel %vm96_vm1, %v1568_v16, 0.0  ;;  %v398_v60 = vsel %vm96_vm1, %v253_v3, 0.0 }
 0x134   :  { %v466_v51 = vmax.f32 %v2204_v14, %v465_v33  ;;  %v331_v42 = vadd.f32 %v330_v59, %v329_v56  ;;  %v471_v13 = vsel %vm96_vm1, %v1667_v44, -inf  ;;  %v415_v2 = vsel %vm96_vm1, %v1578_v22, 0.0 }
 0x135   :  { %v339_v43 = vrot.slane %v338_v46, 2  ;;  %v472_v58 = vmax.f32 %v470_v47, %v471_v13  ;;  %v475_v30 = vmax.f32 %v465_v33, %v471_v13  ;;  %v373_v9 = vrot.slane %v372_v52, 4 }
 0x136   :  { %v468_v29 = vmax.f32 %v466_v51, %v1641_v17  ;;  %v332_v4 = vrot.slane %v331_v42, 1  ;;  %v399_v36 = vadd.f32 %v398_v60, %v397_v61  ;;  %v416_v32 = vsel %vm96_vm1, %v257_v35, 0.0 }
 0x137   :  { %v340_v16 = vadd.f32 %v339_v43, %v338_v46  ;;  %v474_v11 = vmax.f32 %v472_v58, %v1651_v8  ;;  %v374_v27 = vadd.f32 %v373_v9, %v372_v52  ;;  %v417_v9 = vadd.f32 %v416_v32, %v415_v2 }
 0x138   :  { %v506_v28 = vsub.f32 %v1526_v57, %v468_v29  ;;  %v507_v3 = vsub.f32 %v1534_v63, %v468_v29  ;;  %v333_v56 = vadd.f32 %v332_v4, %v331_v42  ;;  %v508_v22 = vsub.f32 %v1657_v34, %v468_v29 }
 0x139   :  { %v509_v18 = vsub.f32 %v1617_v37, %v468_v29  ;;  %v341_v47 = vrot.slane %v340_v16, 1  ;;  %v510_v59 = vsub.f32 %v1534_v63, %v474_v11  ;;  %v511_v33 = vsub.f32 %v1516_v45, %v474_v11 }
 0x13a   :  { %v512_v35 = vsub.f32 %v1667_v44, %v474_v11  ;;  %v449_v39 = vmul.f32 0.17677669, %v333_v56  ;;  %v513_v46 = vsub.f32 %v1619_v38, %v474_v11  ;;  %v538_v14 = vmul.f32 1.442695, %v506_v28 }
 0x13b   :  { %v540_v57 = vmul.f32 1.442695, %v507_v3  ;;  %v342_v51 = vadd.f32 %v341_v47, %v340_v16  ;;  %v542_v61 = vmul.f32 1.442695, %v508_v22  ;;  %v544_v42 = vmul.f32 1.442695, %v509_v18 }
 0x13c   :  { %v546_v13 = vmul.f32 1.442695, %v510_v59  ;;  %v476_v60 = vsel %vm96_vm1, %v449_v39, -inf  ;;  %1222 = vpow2.f32 %v538_v14  ;;  %v548_v52 = vmul.f32 1.442695, %v511_v33 }
 0x13d   :  { %v550_v43 = vmul.f32 1.442695, %v512_v35  ;;  %v450_v29 = vmul.f32 0.17677669, %v342_v51  ;;  %v477_v63 = vmax.f32 %v475_v30, %v476_v60  ;;  %1224 = vpow2.f32 %v540_v57 }
 0x13e   :  { %v552_v45 = vmul.f32 1.442695, %v513_v46  ;;  %1226 = vpow2.f32 %v542_v61  ;;  %v375_v58 = vrot.slane %v374_v27, 2  ;;  %v400_v4 = vrot.slane %v399_v36, 4 }
 0x13f   :  { %v478_v11 = vsel %vm96_vm1, %v450_v29, -inf  ;;  %1228 = vpow2.f32 %v544_v42  ;;  %v424_v16 = vsel %vm96_vm1, %v1582_v23, 0.0  ;;  %v425_v28 = vsel %vm96_vm1, %v259_v40, 0.0 }
 0x140   :  { %v479_v3 = vmax.f32 %v477_v63, %v478_v11  ;;  %v481_v30 = vmax.f32 %v480_v53, %v478_v11  ;;  %1230 = vpow2.f32 %v546_v13  ;;  %v376_v56 = vadd.f32 %v375_v58, %v374_v27 }
 0x141   :  { %1232 = vpow2.f32 %v548_v52  ;;  %v401_v2 = vadd.f32 %v400_v4, %v399_v36  ;;  %v418_v32 = vrot.slane %v417_v9, 4  ;;  %v426_v22 = vadd.f32 %v425_v28, %v424_v16 }
 0x142   :  { %v483_v18 = vmax.f32 %v481_v30, %v1627_v55  ;;  %v514_v47 = vsub.f32 %v1657_v34, %v479_v3  ;;  %v515_v23 = vsub.f32 %v1667_v44, %v479_v3  ;;  %v516_v40 = vsub.f32 %v449_v39, %v479_v3 }
 0x143   :  { %v517_v59 = vsub.f32 %v450_v29, %v479_v3  ;;  %1234 = vpow2.f32 %v550_v43  ;;  %v377_v17 = vrot.slane %v376_v56, 1  ;;  %v402_v8 = vrot.slane %v401_v2, 2 }
 0x144   :  { %v518_v53 = vsub.f32 %v1617_v37, %v483_v18  ;;  %v519_v27 = vsub.f32 %v1619_v38, %v483_v18  ;;  %v520_v33 = vsub.f32 %v450_v29, %v483_v18  ;;  %v521_v36 = vsub.f32 %v1621_v19, %v483_v18 }
 0x145   :  { %1236 = vpow2.f32 %v552_v45  ;;  %v554_v35 = vmul.f32 1.442695, %v514_v47  ;;  %v556_v55 = vmul.f32 1.442695, %v515_v23  ;;  %v558_v46 = vmul.f32 1.442695, %v516_v40 }
 0x146   :  { %v1707_v34 = vpop.eup %1222  ;;  %v560_v44 = vmul.f32 1.442695, %v517_v59  ;;  %v562_v39 = vmul.f32 1.442695, %v518_v53  ;;  %v564_v14 = vmul.f32 1.442695, %v519_v27  ;;  %v378_v57 = vadd.f32 %v377_v17, %v376_v56 }
 0x147   :  { %v1709_v51 = vpop.eup %1224  ;;  %1238 = vpow2.f32 %v554_v35  ;;  %v566_v61 = vmul.f32 1.442695, %v520_v33  ;;  %v568_v37 = vmul.f32 1.442695, %v521_v36  ;;  %v403_v42 = vadd.f32 %v402_v8, %v401_v2 }
 0x148   :  { %v1711_v38 = vpop.eup %1226  ;;  %1240 = vpow2.f32 %v556_v55  ;;  %v634_v19 = vrot.slane %v1709_v51, 7  ;;  %v419_v13 = vadd.f32 %v418_v32, %v417_v9  ;;  %v427_v60 = vrot.slane %v426_v22, 4 }
 0x149   :  { %v1714_v52 = vpop.eup %1228  ;;  %1242 = vpow2.f32 %v558_v46  ;;  %v637_v43 = vrot.slane %v1711_v38, 6  ;;  %v404_v29 = vrot.slane %v403_v42, 1  ;;  %v1717_v63 = vmul.f32 0.17677669, %v378_v57 }
 0x14a   :  { %v1719_v45 = vpop.eup %1230  ;;  %1244 = vpow2.f32 %v560_v44  ;;  %v636_v58 = vsel %vm635_vm2, %v634_v19, %v1707_v34  ;;  %v640_v4 = vrot.slane %v1714_v52, 5  ;;  %v420_v11 = vrot.slane %v419_v13, 2 }
 0x14b   :  { %v1724_v16 = vpop.eup %1232  ;;  %1246 = vpow2.f32 %v562_v39  ;;  %v639_v9 = vsel %vm638_vm3, %v637_v43, %v636_v58  ;;  %v405_v28 = vadd.f32 %v404_v29, %v403_v42  ;;  %v428_v3 = vadd.f32 %v427_v60, %v426_v22 }
 0x14c   :  { %1248 = vpow2.f32 %v564_v14  ;;  %v642_v30 = vsel %vm641_vm4, %v640_v4, %v639_v9  ;;  %v643_v56 = vrot.slane %v1724_v16, 7  ;;  %v421_v2 = vadd.f32 %v420_v11, %v419_v13 }
 0x14d   :  { %v1729_v32 = vpop.eup %1234  ;;  %1250 = vpow2.f32 %v566_v61  ;;  %v694_v18 = vsel %vm693_vm5, %v642_v30, 0.0  ;;  %v429_v47 = vrot.slane %v428_v3, 2  ;;  %v1732_v23 = vmul.f32 0.17677669, %v405_v28 }
 0x14e   :  { %1252 = vpow2.f32 %v568_v37  ;;  %v644_v40 = vsel %vm635_vm2, %v643_v56, %v1719_v45  ;;  %v645_v22 = vrot.slane %v1729_v32, 6  ;;  %v695_v59 = vrot.slane %v694_v18, 4 }
 0x14f   :  { %v1737_v17 = vpop.eup %1236  ;;  %v422_v8 = vrot.slane %v421_v2, 1  ;;  %v430_v53 = vadd.f32 %v429_v47, %v428_v3  ;;  %v487_v27 = vsel %vm96_vm1, %v1717_v63, -inf  ;;  %v489_v33 = vsel %vm96_vm1, %v1623_v49, -inf }
 0x150   :  { %v646_v36 = vsel %vm638_vm3, %v645_v22, %v644_v40  ;;  %v647_v35 = vrot.slane %v1737_v17, 5  ;;  %v696_v55 = vadd.f32 %v695_v59, %v694_v18  ;;  %v2205_v46 = vmax.f32 %v1560_v10, %v1574_v21 }
 0x151   :  { %v1748_v39 = vpop.eup %1238  ;;  %v423_v14 = vadd.f32 %v422_v8, %v421_v2  ;;  %v431_v57 = vrot.slane %v430_v53, 1  ;;  %v492_v61 = vmax.f32 %v1574_v21, %v1532_v62  ;;  %v493_v37 = vsel %vm96_vm1, %v1732_v23, -inf }
 0x152   :  { %v488_v44 = vmax.f32 %v2205_v46, %v487_v27  ;;  %v1754_v42 = vpop.eup %1240  ;;  %v648_v19 = vsel %vm641_vm4, %v647_v35, %v646_v36  ;;  %v697_v13 = vrot.slane %v696_v55, 2  ;;  %v495_v10 = vsel %vm96_vm1, %v1629_v48, -inf }
 0x153   :  { %v1761_v43 = vpop.eup %1242  ;;  %v649_v29 = vrot.slane %v1754_v42, 7  ;;  %v701_v58 = vsel %vm693_vm5, %v648_v19, 0.0  ;;  %v432_v62 = vadd.f32 %v431_v57, %v430_v53  ;;  %v1765_v21 = vmul.f32 0.17677669, %v423_v14 }
 0x154   :  { %v1757_v60 = vmax.f32 %v488_v44, %v489_v33  ;;  %v1767_v4 = vpop.eup %1244  ;;  %v651_v11 = vrot.slane %v1761_v43, 6  ;;  %v698_v9 = vadd.f32 %v697_v13, %v696_v55  ;;  %v702_v28 = vrot.slane %v701_v58, 4 }
 0x155   :  { %v494_v3 = vmax.f32 %v492_v61, %v493_v37  ;;  %v1770_v30 = vpop.eup %1246  ;;  %v650_v56 = vsel %vm635_vm2, %v649_v29, %v1748_v39  ;;  %v653_v2 = vrot.slane %v1767_v4, 5  ;;  %v1775_v18 = vmul.f32 0.17677669, %v432_v62 }
 0x156   :  { %v497_v47 = vmax.f32 %v487_v27, %v493_v37  ;;  %v1777_v40 = vpop.eup %1248  ;;  %v652_v22 = vsel %vm638_vm3, %v651_v11, %v650_v56  ;;  %v699_v59 = vrot.slane %v698_v9, 1  ;;  %v703_v8 = vadd.f32 %v702_v28, %v701_v58 }
 0x157   :  { %v1780_v53 = vmax.f32 %v494_v3, %v495_v10  ;;  %v1782_v36 = vpop.eup %1250  ;;  %v654_v35 = vsel %vm641_vm4, %v653_v2, %v652_v22  ;;  %v655_v55 = vrot.slane %v1777_v40, 7  ;;  %v498_v46 = vsel %vm96_vm1, %v1765_v21, -inf }
 0x158   :  { %v500_v27 = vsel %vm96_vm1, %v1775_v18, -inf  ;;  %v1790_v44 = vpop.eup %1252  ;;  %v657_v14 = vrot.slane %v1782_v36, 6  ;;  %v700_v57 = vadd.f32 %v699_v59, %v698_v9  ;;  %v704_v61 = vrot.slane %v703_v8, 2 }
 0x159   :  { %v708_v37 = vsel %vm693_vm5, %v654_v35, 0.0  ;;  %v656_v19 = vsel %vm635_vm2, %v655_v55, %v1770_v30  ;;  %v659_v13 = vrot.slane %v1790_v44, 5  ;;  %v499_v58 = vmax.f32 %v497_v47, %v498_v46 }
 0x15a   :  { %v709_v29 = vrot.slane %v708_v37, 4  ;;  %v658_v62 = vsel %vm638_vm3, %v657_v14, %v656_v19  ;;  %v705_v11 = vadd.f32 %v704_v61, %v703_v8  ;;  %1254 = vrcp.f32 %v700_v57 }
 0x15b   :  { %v502_v28 = vmax.f32 %v489_v33, %v495_v10  ;;  %v660_v3 = vsel %vm641_vm4, %v659_v13, %v658_v62  ;;  %v1799_v2 = vmax.f32 %v499_v58, %v500_v27  ;;  %v522_v9 = vsub.f32 %v1536_v0, %v1757_v60 }
 0x15c   :  { %v710_v56 = vadd.f32 %v709_v29, %v708_v37  ;;  %v706_v22 = vrot.slane %v705_v11, 1  ;;  %v715_v59 = vsel %vm693_vm5, %v660_v3, 0.0  ;;  %v523_v47 = vsub.f32 %v1544_v5, %v1757_v60 }
 0x15d   :  { %v503_v35 = vmax.f32 %v502_v28, %v500_v27  ;;  %v716_v46 = vrot.slane %v715_v59, 4  ;;  %v524_v33 = vsub.f32 %v1717_v63, %v1757_v60  ;;  %v525_v10 = vsub.f32 %v1623_v49, %v1757_v60 }
 0x15e   :  { %v711_v55 = vrot.slane %v710_v56, 2  ;;  %v707_v8 = vadd.f32 %v706_v22, %v705_v11  ;;  %v526_v0 = vsub.f32 %v1544_v5, %v1780_v53  ;;  %v527_v27 = vsub.f32 %v1519_v50, %v1780_v53 }
 0x15f   :  { %v1811_v14 = vmax.f32 %v503_v35, %v1647_v6  ;;  %v717_v61 = vadd.f32 %v716_v46, %v715_v59  ;;  %v528_v37 = vsub.f32 %v1732_v23, %v1780_v53  ;;  %v529_v19 = vsub.f32 %v1629_v48, %v1780_v53 }
 0x160   :  { %v712_v57 = vadd.f32 %v711_v55, %v710_v56  ;;  %1256 = vrcp.f32 %v707_v8  ;;  %v530_v60 = vsub.f32 %v1717_v63, %v1799_v2  ;;  %v570_v11 = vmul.f32 1.442695, %v522_v9 }
 0x161   :  { %v718_v50 = vrot.slane %v717_v61, 2  ;;  %v572_v22 = vmul.f32 1.442695, %v523_v47  ;;  %v574_v55 = vmul.f32 1.442695, %v524_v33 }
 0x162   :  { %v713_v13 = vrot.slane %v712_v57, 1  ;;  %v576_v46 = vmul.f32 1.442695, %v525_v10  ;;  %v1838_v8 = vmul.f32 1.442695, %v526_v0 }
 0x163   :  { %v719_v3 = vadd.f32 %v718_v50, %v717_v61  ;;  %v1844_v47 = vmul.f32 1.442695, %v527_v27  ;;  %v1846_v61 = vmul.f32 1.442695, %v528_v37 }
 0x164   :  { %v714_v28 = vadd.f32 %v713_v13, %v712_v57  ;;  %v1255_v56 = vpop.eup %1254 }
 0x165   :  { %v720_v59 = vrot.slane %v719_v3, 1  ;;  %v761_v35 = vrot.slane %v1255_v56, %v1456_v26 }
 0x166   :  { %1258 = vrcp.f32 %v714_v28  ;;  %v2207_v28 = vld [vmem:[#allocation14_spill] sm:$0xff] }
 0x167   :  { %1260 = vpow2.f32 %v570_v11  ;;  %v721_v53 = vadd.f32 %v720_v59, %v719_v3  ;;  %v790_v63 = vmul.f32 %v1707_v34, %v761_v35  ;;  %v791_v58 = vmul.f32 %v1709_v51, %v761_v35  ;;  %v2208_v59 = vld [vmem:[#allocation17_spill] sm:$0xff] }
 0x168   :  { %v792_v9 = vmul.f32 %v1711_v38, %v761_v35  ;;  %v793_v57 = vmul.f32 %v1714_v52, %v761_v35  ;;  %1262 = vpow2.f32 %v572_v22  ;;  %v1852_v51 = vmul.f32 1.442695, %v529_v19 }
 0x169   :  { %1264 = vrcp.f32 %v721_v53  ;;  %v825_v33 = vrot.slane %v790_v63, %v1456_v26  ;;  %v829_v10 = vrot.slane %v791_v58, %v1456_v26  ;;  %v1854_v38 = vmul.f32 1.442695, %v530_v60  ;;  %v2206_v63 = vld [vmem:[#allocation19_spill] sm:$0xff] }
 0x16a   :  { %v833_v0 = vrot.slane %v792_v9, %v1456_v26  ;;  %v1257_v13 = vpop.eup %1256  ;;  %v837_v34 = vrot.slane %v793_v57, %v1456_v26  ;;  %1266 = vpow2.f32 %v574_v55 }
 0x16b   :  { %v765_v52 = vrot.slane %v1257_v13, %v1456_v26  ;;  %v950_v27 = vmul.f32 %v825_v33, %v1434_v15  ;;  %v951_v37 = vmul.f32 %v825_v33, %v1454_v25  ;;  %v952_v50 = vmul.f32 %v1428_v12, %v829_v10 }
 0x16c   :  { %v953_v58 = vmul.f32 %v1444_v20, %v829_v10  ;;  %v954_v53 = vmul.f32 %v833_v0, %v1486_v54  ;;  %v1863_v11 = vmul.f32 %v833_v0, %v2206_v63  ;;  %v956_v19 = vmul.f32 %v2207_v28, %v837_v34 }
 0x16d   :  { %v794_v60 = vmul.f32 %v1719_v45, %v765_v52  ;;  %v795_v3 = vmul.f32 %v1724_v16, %v765_v52  ;;  %v796_v56 = vmul.f32 %v1729_v32, %v765_v52  ;;  %v797_v22 = vmul.f32 %v1737_v17, %v765_v52 }
 0x16e   :  { %v1871_v35 = vmul.f32 %v2208_v59, %v837_v34  ;;  %v1014_v55 = vsel %vm96_vm1, %v950_v27, 0.0  ;;  %v1015_v9 = vsel %vm96_vm1, %v952_v50, 0.0  ;;  %1268 = vpow2.f32 %v576_v46 }
 0x16f   :  { %v841_v33 = vrot.slane %v794_v60, %v1456_v26  ;;  %v845_v10 = vrot.slane %v795_v3, %v1456_v26  ;;  %v849_v45 = vrot.slane %v796_v56, %v1456_v26  ;;  %v853_v16 = vrot.slane %v797_v22, %v1456_v26 }
 0x170   :  { %v1259_v57 = vpop.eup %1258  ;;  %v1016_v0 = vadd.f32 %v1015_v9, %v1014_v55  ;;  %v1017_v13 = vsel %vm96_vm1, %v954_v53, 0.0  ;;  %v1019_v34 = vsel %vm96_vm1, %v956_v19, 0.0  ;;  %1270 = vpow2.f32 %v1838_v8 }
 0x171   :  { %v1879_v32 = vpop.eup %1260  ;;  %v769_v17 = vrot.slane %v1259_v57, %v1456_v26  ;;  %v958_v46 = vmul.f32 %v841_v33, %v1434_v15  ;;  %v959_v52 = vmul.f32 %v841_v33, %v1454_v25  ;;  %v960_v27 = vmul.f32 %v1428_v12, %v845_v10 }
 0x172   :  { %v961_v50 = vmul.f32 %v1444_v20, %v845_v10  ;;  %v1888_v60 = vpop.eup %1262  ;;  %v962_v19 = vmul.f32 %v849_v45, %v1486_v54  ;;  %v963_v9 = vmul.f32 %v849_v45, %v2206_v63  ;;  %v964_v57 = vmul.f32 %v2207_v28, %v853_v16 }
 0x173   :  { %v798_v3 = vmul.f32 %v1748_v39, %v769_v17  ;;  %v799_v56 = vmul.f32 %v1754_v42, %v769_v17  ;;  %v800_v22 = vmul.f32 %v1761_v43, %v769_v17  ;;  %v801_v53 = vmul.f32 %v1767_v4, %v769_v17  ;;  %v1265_v55 = vpop.eup %1264 }
 0x174   :  { %v965_v33 = vmul.f32 %v2208_v59, %v853_v16  ;;  %v1898_v10 = vpop.eup %1266  ;;  %v773_v62 = vrot.slane %v1265_v55, %v1456_v26  ;;  %v1021_v43 = vsel %vm96_vm1, %v951_v37, 0.0  ;;  %v1018_v29 = vadd.f32 %v1017_v13, %v1016_v0 }
 0x175   :  { %v857_v39 = vrot.slane %v798_v3, %v1456_v26  ;;  %v861_v42 = vrot.slane %v799_v56, %v1456_v26  ;;  %v865_v4 = vrot.slane %v800_v22, %v1456_v26  ;;  %v869_v17 = vrot.slane %v801_v53, %v1456_v26 }
 0x176   :  { %v1022_v45 = vsel %vm96_vm1, %v953_v58, 0.0  ;;  %v802_v5 = vmul.f32 %v1770_v30, %v773_v62  ;;  %v803_v16 = vmul.f32 %v1777_v40, %v773_v62  ;;  %v804_v6 = vmul.f32 %v1782_v36, %v773_v62 }
 0x177   :  { %v805_v55 = vmul.f32 %v1790_v44, %v773_v62  ;;  %v966_v3 = vmul.f32 %v857_v39, %v1434_v15  ;;  %v967_v56 = vmul.f32 %v857_v39, %v1454_v25  ;;  %v968_v37 = vmul.f32 %v1428_v12, %v861_v42 }
 0x178   :  { %v969_v22 = vmul.f32 %v1444_v20, %v861_v42  ;;  %v1915_v53 = vpop.eup %1268  ;;  %v873_v58 = vrot.slane %v802_v5, %v1456_v26  ;;  %v877_v30 = vrot.slane %v803_v16, %v1456_v26  ;;  %v881_v40 = vrot.slane %v804_v6, %v1456_v26 }
 0x179   :  { %v885_v36 = vrot.slane %v805_v55, %v1456_v26  ;;  %v970_v44 = vmul.f32 %v865_v4, %v1486_v54  ;;  %v971_v62 = vmul.f32 %v865_v4, %v2206_v63  ;;  %v972_v0 = vmul.f32 %v2207_v28, %v869_v17 }
 0x17a   :  { %v973_v13 = vmul.f32 %v2208_v59, %v869_v17  ;;  %v974_v39 = vmul.f32 %v873_v58, %v1434_v15  ;;  %v975_v42 = vmul.f32 %v873_v58, %v1454_v25  ;;  %v976_v5 = vmul.f32 %v1428_v12, %v877_v30 }
 0x17b   :  { %v977_v16 = vmul.f32 %v1444_v20, %v877_v30  ;;  %v978_v6 = vmul.f32 %v881_v40, %v1486_v54  ;;  %v979_v55 = vmul.f32 %v881_v40, %v2206_v63  ;;  %v980_v1 = vmul.f32 %v2207_v28, %v885_v36 }
 0x17c   :  { %v981_v4 = vmul.f32 %v2208_v59, %v885_v36  ;;  %v1020_v7 = vadd.f32 %v1019_v34, %v1018_v29  ;;  %v1023_v24 = vadd.f32 %v1022_v45, %v1021_v43  ;;  %v1024_v17 = vsel %vm96_vm1, %v1863_v11, 0.0 }
 0x17d   :  { %v1028_v15 = vsel %vm96_vm1, %v958_v46, 0.0  ;;  %v1026_v12 = vsel %vm96_vm1, %v1871_v35, 0.0  ;;  %v1029_v20 = vsel %vm96_vm1, %v960_v27, 0.0  ;;  %v1031_v25 = vsel %vm96_vm1, %v962_v19, 0.0 }
 0x17e   :  { %v1035_v54 = vsel %vm96_vm1, %v959_v52, 0.0  ;;  %v1025_v63 = vadd.f32 %v1024_v17, %v1023_v24  ;;  %v1030_v28 = vadd.f32 %v1029_v20, %v1028_v15  ;;  %v1033_v59 = vsel %vm96_vm1, %v964_v57, 0.0  ;;  %1126 = vst.msk [vmem:[#allocation7] sm:$0xff] %vm96_vm1, %v1020_v7 }
 0x17f   :  { %v1036_v29 = vsel %vm96_vm1, %v961_v50, 0.0  ;;  %v1038_v34 = vsel %vm96_vm1, %v963_v9, 0.0  ;;  %v1042_v46 = vsel %vm96_vm1, %v966_v3, 0.0  ;;  %v1043_v35 = vsel %vm96_vm1, %v968_v37, 0.0 }
 0x180   :  { %v1037_v11 = vadd.f32 %v1036_v29, %v1035_v54  ;;  %v1027_v27 = vadd.f32 %v1026_v12, %v1025_v63  ;;  %v1032_v43 = vadd.f32 %v1031_v25, %v1030_v28  ;;  %v1040_v19 = vsel %vm96_vm1, %v965_v33, 0.0 }
 0x181   :  { %v1044_v52 = vadd.f32 %v1043_v35, %v1042_v46  ;;  %v1045_v45 = vsel %vm96_vm1, %v970_v44, 0.0  ;;  %v1049_v57 = vsel %vm96_vm1, %v967_v56, 0.0  ;;  %v1050_v50 = vsel %vm96_vm1, %v969_v22, 0.0 }
 0x182   :  { %v1039_v24 = vadd.f32 %v1038_v34, %v1037_v11  ;;  %v1034_v7 = vadd.f32 %v1033_v59, %v1032_v43  ;;  %v1047_v9 = vsel %vm96_vm1, %v972_v0, 0.0  ;;  %v1051_v30 = vadd.f32 %v1050_v50, %v1049_v57  ;;  %1127 = vst.msk [vmem:[#allocation7 + $0x8] sm:$0xff] %vm96_vm1, %v1027_v27  ;;  %v2003_v43 = vpop.eup %1270 }
 0x183   :  { %v1046_v58 = vadd.f32 %v1045_v45, %v1044_v52  ;;  %v1052_v37 = vsel %vm96_vm1, %v971_v62, 0.0  ;;  %v1056_v33 = vsel %vm96_vm1, %v974_v39, 0.0  ;;  %v1057_v40 = vsel %vm96_vm1, %v976_v5, 0.0 }
 0x184   :  { %v1041_v3 = vadd.f32 %v1040_v19, %v1039_v24  ;;  %v1053_v44 = vadd.f32 %v1052_v37, %v1051_v30  ;;  %v1058_v17 = vadd.f32 %v1057_v40, %v1056_v33  ;;  %1128 = vst.msk [vmem:[#allocation7 + $0x10] sm:$0xff] %vm96_vm1, %v1034_v7  ;;  %v2209_v56 = vsub.f32 %v1732_v23, %v1799_v2 }
 0x185   :  { %v1048_v36 = vadd.f32 %v1047_v9, %v1046_v58  ;;  %v1054_v0 = vsel %vm96_vm1, %v973_v13, 0.0  ;;  %v1059_v15 = vsel %vm96_vm1, %v978_v6, 0.0  ;;  %v1063_v12 = vsel %vm96_vm1, %v975_v42, 0.0 }
 0x186   :  { %v588_v22 = vmul.f32 1.442695, %v2209_v56  ;;  %v1064_v62 = vsel %vm96_vm1, %v977_v16, 0.0  ;;  %1129 = vst.msk [vmem:[#allocation7 + $0x18] sm:$0xff] %vm96_vm1, %v1041_v3  ;;  %v1055_v39 = vadd.f32 %v1054_v0, %v1053_v44  ;;  %v1060_v5 = vadd.f32 %v1059_v15, %v1058_v17 }
 0x187   :  { %v1065_v20 = vadd.f32 %v1064_v62, %v1063_v12  ;;  %1130 = vst.msk [vmem:[#allocation7 + $0x20] sm:$0xff] %vm96_vm1, %v1048_v36  ;;  %v2210_v25 = vsub.f32 %v1765_v21, %v1799_v2  ;;  %v1061_v54 = vsel %vm96_vm1, %v980_v1, 0.0  ;;  %v1066_v13 = vsel %vm96_vm1, %v979_v55, 0.0 }
 0x188   :  { %v661_v42 = vrot.slane %v1888_v60, 7  ;;  %v1062_v16 = vadd.f32 %v1061_v54, %v1060_v5  ;;  %1131 = vst.msk [vmem:[#allocation7 + $0x28] sm:$0xff] %vm96_vm1, %v1055_v39  ;;  %1272 = vpow2.f32 %v1844_v47  ;;  %v663_v63 = vrot.slane %v1898_v10, 6 }
 0x189   :  { %v590_v23 = vmul.f32 1.442695, %v2210_v25  ;;  %v1067_v6 = vadd.f32 %v1066_v13, %v1065_v20  ;;  %v1068_v28 = vsel %vm96_vm1, %v981_v4, 0.0  ;;  %1274 = vpow2.f32 %v1846_v61 }
 0x18a   :  { %v662_v1 = vsel %vm635_vm2, %v661_v42, %v1879_v32  ;;  %v665_v21 = vrot.slane %v1915_v53, 5  ;;  %1132 = vst.msk [vmem:[#allocation7 + $0x30] sm:$0xff] %vm96_vm1, %v1062_v16  ;;  %1276 = vpow2.f32 %v1852_v51  ;;  %v2211_v55 = vsub.f32 %v1775_v18, %v1799_v2 }
 0x18b   :  { %v1069_v8 = vadd.f32 %v1068_v28, %v1067_v6  ;;  %v664_v59 = vsel %vm638_vm3, %v663_v63, %v662_v1  ;;  %1278 = vpow2.f32 %v1854_v38  ;;  %v2212_v61 = vsub.f32 %v1623_v49, %v1811_v14 }
 0x18c   :  { %v592_v47 = vmul.f32 1.442695, %v2211_v55  ;;  %v666_v29 = vsel %vm641_vm4, %v665_v21, %v664_v59  ;;  %1280 = vpow2.f32 %v588_v22  ;;  %v2213_v51 = vsub.f32 %v1629_v48, %v1811_v14 }
 0x18d   :  { %v594_v4 = vmul.f32 1.442695, %v2212_v61  ;;  %1133 = vst.msk [vmem:[#allocation7 + $0x38] sm:$0xff] %vm96_vm1, %v1069_v8  ;;  %v722_v2 = vsel %vm693_vm5, %v666_v29, 0.0  ;;  %1282 = vpow2.f32 %v590_v23  ;;  %v2214_v34 = vsub.f32 %v1775_v18, %v1811_v14 }
 0x18e   :  { %v596_v11 = vmul.f32 1.442695, %v2213_v51  ;;  %v723_v46 = vrot.slane %v722_v2, 4  ;;  %1284 = vpow2.f32 %v592_v47  ;;  %v2215_v49 = vsub.f32 %v1634_v41, %v1811_v14 }
 0x18f   :  { %v598_v38 = vmul.f32 1.442695, %v2214_v34  ;;  %1286 = vpow2.f32 %v594_v4 }
 0x190   :  { %v600_v35 = vmul.f32 1.442695, %v2215_v49  ;;  %v724_v27 = vadd.f32 %v723_v46, %v722_v2  ;;  %1288 = vpow2.f32 %v596_v11 }
 0x191   :  { %1290 = vpow2.f32 %v598_v38 }
 0x192   :  { %v725_v48 = vrot.slane %v724_v27, 2  ;;  %v2005_v19 = vpop.eup %1272  ;;  %1292 = vpow2.f32 %v600_v35 }
 0x193   :  { %v2007_v52 = vpop.eup %1274  ;;  %v667_v18 = vrot.slane %v2005_v19, 7 }
 0x194   :  { %v726_v24 = vadd.f32 %v725_v48, %v724_v27  ;;  %v2010_v45 = vpop.eup %1276  ;;  %v669_v41 = vrot.slane %v2007_v52, 6 }
 0x195   :  { %v2013_v14 = vpop.eup %1278  ;;  %v668_v57 = vsel %vm635_vm2, %v667_v18, %v2003_v43  ;;  %v671_v50 = vrot.slane %v2010_v45, 5 }
 0x196   :  { %v727_v7 = vrot.slane %v726_v24, 1  ;;  %v2018_v58 = vpop.eup %1280  ;;  %v670_v9 = vsel %vm638_vm3, %v669_v41, %v668_v57 }
 0x197   :  { %v2021_v30 = vpop.eup %1282  ;;  %v672_v3 = vsel %vm641_vm4, %v671_v50, %v670_v9  ;;  %v673_v37 = vrot.slane %v2018_v58, 7  ;;  %v2217_v9 = vld [vmem:[#allocation11_spill] sm:$0xff] }
 0x198   :  { %v728_v33 = vadd.f32 %v727_v7, %v726_v24  ;;  %v2025_v40 = vpop.eup %1284  ;;  %v675_v36 = vrot.slane %v2021_v30, 6  ;;  %v729_v44 = vsel %vm693_vm5, %v672_v3, 0.0  ;;  %v2216_v7 = vld [vmem:[#allocation12_spill] sm:$0xff]  ;;  %v2218_v3 = vld [vmem:[#allocation13_spill] sm:$0xff] }
 0x199   :  { %v2029_v17 = vpop.eup %1286  ;;  %v674_v56 = vsel %vm635_vm2, %v673_v37, %v2013_v14  ;;  %v677_v22 = vrot.slane %v2025_v40, 5  ;;  %v730_v0 = vrot.slane %v729_v44, 4 }
 0x19a   :  { %1294 = vrcp.f32 %v728_v33  ;;  %v2034_v15 = vpop.eup %1288  ;;  %v676_v12 = vsel %vm638_vm3, %v675_v36, %v674_v56  ;;  %v2219_v33 = vld [vmem:[#allocation16_spill] sm:$0xff] }
 0x19b   :  { %v2037_v62 = vpop.eup %1290  ;;  %v678_v39 = vsel %vm641_vm4, %v677_v22, %v676_v12  ;;  %v679_v5 = vrot.slane %v2034_v15, 7  ;;  %v731_v20 = vadd.f32 %v730_v0, %v729_v44  ;;  %v2220_v44 = vld [vmem:[#allocation20_spill] sm:$0xff]  ;;  %v2221_v22 = vld [vmem:[#allocation15_spill] sm:$0xff]  ;;  %v2222_v12 = vld [vmem:[#allocation18_spill] sm:$0xff] }
 0x19c   :  { %v2041_v25 = vpop.eup %1292  ;;  %v681_v23 = vrot.slane %v2037_v62, 6  ;;  %v736_v54 = vsel %vm693_vm5, %v678_v39, 0.0 }
 0x19d   :  { %v680_v13 = vsel %vm635_vm2, %v679_v5, %v2029_v17  ;;  %v683_v42 = vrot.slane %v2041_v25, 5  ;;  %v732_v16 = vrot.slane %v731_v20, 2  ;;  %v737_v6 = vrot.slane %v736_v54, 4 }
 0x19e   :  { %v682_v63 = vsel %vm638_vm3, %v681_v23, %v680_v13 }
 0x19f   :  { %v684_v28 = vsel %vm641_vm4, %v683_v42, %v682_v63  ;;  %v733_v1 = vadd.f32 %v732_v16, %v731_v20  ;;  %v738_v21 = vadd.f32 %v737_v6, %v736_v54 }
 0x1a0   :  { %v743_v8 = vsel %vm693_vm5, %v684_v28, 0.0 }
 0x1a1   :  { %v734_v55 = vrot.slane %v733_v1, 1  ;;  %v739_v47 = vrot.slane %v738_v21, 2  ;;  %v744_v59 = vrot.slane %v743_v8, 4 }
 0x1a3   :  { %v735_v4 = vadd.f32 %v734_v55, %v733_v1  ;;  %v740_v29 = vadd.f32 %v739_v47, %v738_v21  ;;  %v745_v51 = vadd.f32 %v744_v59, %v743_v8 }
 0x1a4   :  { %v1295_v61 = vpop.eup %1294 }
 0x1a5   :  { %v777_v11 = vrot.slane %v1295_v61, %v1456_v26  ;;  %v741_v2 = vrot.slane %v740_v29, 1  ;;  %v746_v34 = vrot.slane %v745_v51, 2  ;;  %1296 = vrcp.f32 %v735_v4 }
 0x1a7   :  { %v806_v38 = vmul.f32 %v1879_v32, %v777_v11  ;;  %v807_v46 = vmul.f32 %v1888_v60, %v777_v11  ;;  %v808_v49 = vmul.f32 %v1898_v10, %v777_v11  ;;  %v809_v35 = vmul.f32 %v1915_v53, %v777_v11 }
 0x1a8   :  { %v742_v27 = vadd.f32 %v741_v2, %v740_v29  ;;  %v747_v48 = vadd.f32 %v746_v34, %v745_v51 }
 0x1a9   :  { %v889_v18 = vrot.slane %v806_v38, %v1456_v26  ;;  %v893_v24 = vrot.slane %v807_v46, %v1456_v26  ;;  %v897_v41 = vrot.slane %v808_v49, %v1456_v26  ;;  %v901_v57 = vrot.slane %v809_v35, %v1456_v26 }
 0x1aa   :  { %v748_v50 = vrot.slane %v747_v48, 1  ;;  %1298 = vrcp.f32 %v742_v27 }
 0x1ab   :  { %v982_v32 = vmul.f32 %v889_v18, %v2216_v7  ;;  %v983_v60 = vmul.f32 %v889_v18, %v1463_v31  ;;  %v984_v10 = vmul.f32 %v2217_v9, %v893_v24  ;;  %v985_v53 = vmul.f32 %v2218_v3, %v893_v24 }
 0x1ac   :  { %v749_v37 = vadd.f32 %v748_v50, %v747_v48  ;;  %v986_v36 = vmul.f32 %v897_v41, %v2219_v33  ;;  %v987_v56 = vmul.f32 %v897_v41, %v2220_v44  ;;  %v988_v0 = vmul.f32 %v2221_v22, %v901_v57 }
 0x1ad   :  { %v989_v39 = vmul.f32 %v2222_v12, %v901_v57  ;;  %v1070_v5 = vsel %vm96_vm1, %v982_v32, 0.0  ;;  %v1071_v20 = vsel %vm96_vm1, %v984_v10, 0.0  ;;  %v1077_v23 = vsel %vm96_vm1, %v983_v60, 0.0 }
 0x1ae   :  { %1300 = vrcp.f32 %v749_v37  ;;  %v1072_v54 = vadd.f32 %v1071_v20, %v1070_v5  ;;  %v1073_v13 = vsel %vm96_vm1, %v986_v36, 0.0  ;;  %v1078_v42 = vsel %vm96_vm1, %v985_v53, 0.0 }
 0x1af   :  { %v1297_v16 = vpop.eup %1296  ;;  %v1079_v63 = vadd.f32 %v1078_v42, %v1077_v23  ;;  %v1075_v1 = vsel %vm96_vm1, %v988_v0, 0.0  ;;  %v1080_v21 = vsel %vm96_vm1, %v987_v56, 0.0  ;;  %v1082_v47 = vsel %vm96_vm1, %v989_v39, 0.0 }
 0x1b0   :  { %v1074_v6 = vadd.f32 %v1073_v13, %v1072_v54  ;;  %v781_v28 = vrot.slane %v1297_v16, %v1456_v26 }
 0x1b1   :  { %v1081_v55 = vadd.f32 %v1080_v21, %v1079_v63 }
 0x1b2   :  { %v1076_v8 = vadd.f32 %v1075_v1, %v1074_v6  ;;  %v810_v59 = vmul.f32 %v2003_v43, %v781_v28  ;;  %v811_v61 = vmul.f32 %v2005_v19, %v781_v28  ;;  %v812_v4 = vmul.f32 %v2007_v52, %v781_v28 }
 0x1b3   :  { %v813_v29 = vmul.f32 %v2010_v45, %v781_v28  ;;  %v1083_v11 = vadd.f32 %v1082_v47, %v1081_v55 }
 0x1b4   :  { %v1299_v51 = vpop.eup %1298  ;;  %1134 = vst.msk [vmem:[#allocation7 + $0x40] sm:$0xff] %vm96_vm1, %v1076_v8  ;;  %v905_v34 = vrot.slane %v810_v59, %v1456_v26  ;;  %v909_v38 = vrot.slane %v811_v61, %v1456_v26  ;;  %v913_v46 = vrot.slane %v812_v4, %v1456_v26 }
 0x1b5   :  { %v785_v2 = vrot.slane %v1299_v51, %v1456_v26  ;;  %v917_v43 = vrot.slane %v813_v29, %v1456_v26  ;;  %1135 = vst.msk [vmem:[#allocation7 + $0x48] sm:$0xff] %vm96_vm1, %v1083_v11 }
 0x1b6   :  { %v990_v27 = vmul.f32 %v905_v34, %v2216_v7  ;;  %v991_v48 = vmul.f32 %v905_v34, %v1463_v31  ;;  %v992_v18 = vmul.f32 %v2217_v9, %v909_v38  ;;  %v993_v24 = vmul.f32 %v2218_v3, %v909_v38 }
 0x1b7   :  { %v814_v19 = vmul.f32 %v2013_v14, %v785_v2  ;;  %v815_v52 = vmul.f32 %v2018_v58, %v785_v2  ;;  %v816_v45 = vmul.f32 %v2021_v30, %v785_v2  ;;  %v817_v49 = vmul.f32 %v2025_v40, %v785_v2 }
 0x1b8   :  { %v1301_v35 = vpop.eup %1300  ;;  %v994_v40 = vmul.f32 %v913_v46, %v2219_v33  ;;  %v995_v50 = vmul.f32 %v913_v46, %v2220_v44  ;;  %v996_v32 = vmul.f32 %v2221_v22, %v917_v43  ;;  %v997_v36 = vmul.f32 %v2222_v12, %v917_v43 }
 0x1b9   :  { %v789_v41 = vrot.slane %v1301_v35, %v1456_v26  ;;  %v921_v57 = vrot.slane %v814_v19, %v1456_v26  ;;  %v925_v14 = vrot.slane %v815_v52, %v1456_v26  ;;  %v929_v58 = vrot.slane %v816_v45, %v1456_v26 }
 0x1ba   :  { %v933_v30 = vrot.slane %v817_v49, %v1456_v26  ;;  %v1084_v8 = vsel %vm96_vm1, %v990_v27, 0.0  ;;  %v1085_v55 = vsel %vm96_vm1, %v992_v18, 0.0 }
 0x1bb   :  { %v818_v60 = vmul.f32 %v2029_v17, %v789_v41  ;;  %v819_v10 = vmul.f32 %v2034_v15, %v789_v41  ;;  %v820_v53 = vmul.f32 %v2037_v62, %v789_v41  ;;  %v821_v37 = vmul.f32 %v2041_v25, %v789_v41 }
 0x1bc   :  { %v998_v56 = vmul.f32 %v921_v57, %v2216_v7  ;;  %v999_v0 = vmul.f32 %v921_v57, %v1463_v31  ;;  %v1000_v39 = vmul.f32 %v2217_v9, %v925_v14  ;;  %v1001_v62 = vmul.f32 %v2218_v3, %v925_v14 }
 0x1bd   :  { %v937_v5 = vrot.slane %v818_v60, %v1456_v26  ;;  %v941_v20 = vrot.slane %v819_v10, %v1456_v26  ;;  %v945_v17 = vrot.slane %v820_v53, %v1456_v26  ;;  %v949_v15 = vrot.slane %v821_v37, %v1456_v26 }
 0x1be   :  { %v1002_v25 = vmul.f32 %v929_v58, %v2219_v33  ;;  %v1003_v23 = vmul.f32 %v929_v58, %v2220_v44  ;;  %v1004_v54 = vmul.f32 %v2221_v22, %v933_v30  ;;  %v1005_v13 = vmul.f32 %v2222_v12, %v933_v30 }
 0x1bf   :  { %v1006_v42 = vmul.f32 %v937_v5, %v2216_v7  ;;  %v1007_v16 = vmul.f32 %v937_v5, %v1463_v31  ;;  %v1008_v6 = vmul.f32 %v2217_v9, %v941_v20  ;;  %v1009_v63 = vmul.f32 %v2218_v3, %v941_v20 }
 0x1c0   :  { %v1010_v26 = vmul.f32 %v945_v17, %v2219_v33  ;;  %v1011_v28 = vmul.f32 %v945_v17, %v2220_v44  ;;  %v1012_v1 = vmul.f32 %v2221_v22, %v949_v15  ;;  %v1013_v21 = vmul.f32 %v2222_v12, %v949_v15 }
 0x1c1   :  { %v1086_v47 = vadd.f32 %v1085_v55, %v1084_v8  ;;  %v1091_v7 = vsel %vm96_vm1, %v991_v48, 0.0  ;;  %v1092_v31 = vsel %vm96_vm1, %v993_v24, 0.0  ;;  %v1087_v9 = vsel %vm96_vm1, %v994_v40, 0.0 }
 0x1c2   :  { %v1089_v3 = vsel %vm96_vm1, %v996_v32, 0.0  ;;  %v1093_v33 = vadd.f32 %v1092_v31, %v1091_v7  ;;  %v1098_v44 = vsel %vm96_vm1, %v998_v56, 0.0  ;;  %v1094_v22 = vsel %vm96_vm1, %v995_v50, 0.0 }
 0x1c3   :  { %v1088_v59 = vadd.f32 %v1087_v9, %v1086_v47  ;;  %v1096_v12 = vsel %vm96_vm1, %v997_v36, 0.0  ;;  %v1099_v61 = vsel %vm96_vm1, %v1000_v39, 0.0  ;;  %v1105_v51 = vsel %vm96_vm1, %v999_v0, 0.0 }
 0x1c4   :  { %v1095_v4 = vadd.f32 %v1094_v22, %v1093_v33  ;;  %v1100_v29 = vadd.f32 %v1099_v61, %v1098_v44  ;;  %v1106_v11 = vsel %vm96_vm1, %v1001_v62, 0.0  ;;  %v1101_v34 = vsel %vm96_vm1, %v1002_v25, 0.0 }
 0x1c5   :  { %v1090_v2 = vadd.f32 %v1089_v3, %v1088_v59  ;;  %v1107_v38 = vadd.f32 %v1106_v11, %v1105_v51  ;;  %v1108_v46 = vsel %vm96_vm1, %v1003_v23, 0.0  ;;  %v1112_v52 = vsel %vm96_vm1, %v1006_v42, 0.0 }
 0x1c6   :  { %v1097_v43 = vadd.f32 %v1096_v12, %v1095_v4  ;;  %v1102_v19 = vadd.f32 %v1101_v34, %v1100_v29  ;;  %v1113_v45 = vsel %vm96_vm1, %v1008_v6, 0.0  ;;  %v1103_v49 = vsel %vm96_vm1, %v1004_v54, 0.0 }
 0x1c7   :  { %v1109_v35 = vadd.f32 %v1108_v46, %v1107_v38  ;;  %v1110_v27 = vsel %vm96_vm1, %v1005_v13, 0.0  ;;  %v1114_v48 = vadd.f32 %v1113_v45, %v1112_v52  ;;  %1136 = vst.msk [vmem:[#allocation7 + $0x50] sm:$0xff] %vm96_vm1, %v1090_v2  ;;  %v1115_v24 = vsel %vm96_vm1, %v1010_v26, 0.0 }
 0x1c8   :  { %v1104_v18 = vadd.f32 %v1103_v49, %v1102_v19  ;;  %v1119_v41 = vsel %vm96_vm1, %v1007_v16, 0.0  ;;  %v1120_v57 = vsel %vm96_vm1, %v1009_v63, 0.0  ;;  %1137 = vst.msk [vmem:[#allocation7 + $0x58] sm:$0xff] %vm96_vm1, %v1097_v43  ;;  %v1117_v40 = vsel %vm96_vm1, %v1012_v1, 0.0 }
 0x1c9   :  { %v1111_v14 = vadd.f32 %v1110_v27, %v1109_v35  ;;  %v1116_v58 = vadd.f32 %v1115_v24, %v1114_v48  ;;  %v1121_v30 = vadd.f32 %v1120_v57, %v1119_v41  ;;  %v1122_v50 = vsel %vm96_vm1, %v1011_v28, 0.0 }
 0x1ca   :  { %1138 = vst.msk [vmem:[#allocation7 + $0x60] sm:$0xff] %vm96_vm1, %v1104_v18  ;;  %v1124_v10 = vsel %vm96_vm1, %v1013_v21, 0.0 }
 0x1cb   :  { %v1118_v32 = vadd.f32 %v1117_v40, %v1116_v58  ;;  %v1123_v60 = vadd.f32 %v1122_v50, %v1121_v30  ;;  %1139 = vst.msk [vmem:[#allocation7 + $0x68] sm:$0xff] %vm96_vm1, %v1111_v14 }
 0x1cd   :  { %v1125_v53 = vadd.f32 %v1124_v10, %v1123_v60  ;;  %1140 = vst.msk [vmem:[#allocation7 + $0x70] sm:$0xff] %vm96_vm1, %v1118_v32 }
 0x1cf   :  { %1141 = vst.msk [vmem:[#allocation7 + $0x78] sm:$0xff] %vm96_vm1, %v1125_v53 }
 0x1d0   :  { %1357 = shalt.err (!%p1354_p6)
}
 0x1d1   :  { %s1358_s10 = scalar_lea.hbm %s2173_s2, 2048 }
 0x1d2   :  { %p1359_p7 = scmp.ne.s32.totalorder %s2173_s2, %s1358_s10  ;;  %p1362_p8 = scmp.lt.u32.totalorder %s1358_s10, %s2173_s2 }
 0x1d4   :  { %p1364_p9 = pnand %p1362_p8, %p1359_p7 }
 0x1d6   :  { %1367 = shalt.err (!%p1364_p9)
}
 0x1d7   :  { %s1379_s15 = smov 128   ;;  %s1380_s16 = smov 8  }
 0x1d8   :  { %1153 = dma.vmem_to_hbm [thread:$0]  %s1148_s6, 2048, %s2173_s2, [#allocation4], %s1379_s15, %s1379_s15, %s1380_s16  }
 0x1d9   :  { %1372 = dma.done.wait [#allocation4], 2048  }
 0x1da   :  { %1373 = vsyncadd [#allocation4], 4294965248 }
 0x1db   :  { %1157 = vsyncpa [#allocation3], 1 }
 0x1dc   :  { %1158 = vsyncpa [#allocation6], 1 }
 0x1dd   :  { %1159 = vsyncpa [#allocation4], 1 }

</bundles_post_ra>
